<compile_context>
chip_gen: v7x
topology: tpu7x:2x2x1
jax: 0.10.0
libtpu: 0.0.40
codegen_flags: <defaults>
</compile_context>

<pallas_src>
import math

import jax
import jax.numpy as jnp
from jax.experimental import pallas as pl
from jax.experimental.pallas import tpu as pltpu


_DEFAULT_SMALL_FALLBACK_BYTES = 2 * 1024 * 1024   # below this, jnp.concatenate wins
_DEFAULT_MAX_SPLITS = 4                            # concurrent sub-DMAs per input
_MIN_SPLIT_BYTES = 128 * 1024                      # never create sub-128KiB descriptors


def _ceil_div(a, b):
    return -(-a // b)


def _build_copy_plan(lengths, outer, col_offsets, itemsize, max_splits):
    """Static list of (input_idx, src_index, dst_index) HBM->HBM sub-copies.

    All refs are 2-D: inputs are (outer, length_i), output is (outer, total_len).
    Because the (C_i, inner) dims were flattened by the wrapper, every per-row
    destination run is one contiguous burst of length_i * itemsize bytes.
    """
    plan = []
    for i, (length, col_off) in enumerate(zip(lengths, col_offsets)):
        if length == 0:
            continue
        total_bytes_i = outer * length * itemsize
        want = max(1, min(max_splits, total_bytes_i // _MIN_SPLIT_BYTES))
        if outer == 1:
            # Fully contiguous destination (batch-1): split the single linear
            # run into `want` concurrent contiguous sub-copies.
            n = int(min(want, length))
            step = _ceil_div(length, n)
            for k in range(n):
                a = k * step
                b = min((k + 1) * step, length)
                if a >= b:
                    continue
                plan.append((i,
                             (slice(0, 1), slice(a, b)),
                             (slice(0, 1), slice(col_off + a, col_off + b))))
        else:
            # Split along rows so every sub-copy stays row-contiguous.
            n = int(min(want, outer))
            step = _ceil_div(outer, n)
            for k in range(n):
                r0 = k * step
                r1 = min((k + 1) * step, outer)
                if r0 >= r1:
                    continue
                plan.append((i,
                             (slice(r0, r1), slice(0, length)),
                             (slice(r0, r1), slice(col_off, col_off + length))))
    return plan


def _make_concat_dma_kernel(copy_plan, num_inputs):
    """Kernel factory: refs = (*in_hbm_refs, out_hbm_ref, dma_sems)."""

    def kernel(*refs):
        in_refs = refs[:num_inputs]
        out_ref = refs[num_inputs]
        sems = refs[num_inputs + 1]
        copies = []
        for s, (i, src_idx, dst_idx) in enumerate(copy_plan):
            cp = pltpu.make_async_copy(in_refs[i].at[src_idx],
                                       out_ref.at[dst_idx],
                                       sems.at[s])
            cp.start()
            copies.append(cp)
        # Block until every transfer has landed before the kernel completes.
        for cp in copies:
            cp.wait()

    return kernel


def pallas_concat(xs, dimension=1, *,
                  small_fallback_bytes=_DEFAULT_SMALL_FALLBACK_BYTES,
                  max_splits_per_input=_DEFAULT_MAX_SPLITS):
    """Equivalent of torch.cat(xs, dim=dimension)."""
    xs = list(xs)
    assert len(xs) >= 1, "torch.cat requires a non-empty tensor list"
    nd = xs[0].ndim
    d = dimension if dimension >= 0 else dimension + nd
    assert 0 <= d < nd, (dimension, nd)

    # torch.cat promotes mixed dtypes; mirror that.
    out_dtype = jnp.result_type(*[x.dtype for x in xs])
    xs = [x.astype(out_dtype) for x in xs]

    # All dims except `d` must match.
    ref_shape = xs[0].shape
    for x in xs:
        assert x.ndim == nd
        for ax in range(nd):
            if ax != d:
                assert x.shape[ax] == ref_shape[ax], (x.shape, ref_shape, d)

    sizes = [x.shape[d] for x in xs]
    total = sum(sizes)
    out_shape = ref_shape[:d] + (total,) + ref_shape[d + 1:]

    outer = math.prod(ref_shape[:d])
    inner = math.prod(ref_shape[d + 1:])
    itemsize = jnp.dtype(out_dtype).itemsize
    total_bytes = outer * total * inner * itemsize

    # Drop empty operands (torch.cat allows them); they contribute nothing.
    nonempty = [(x, c) for x, c in zip(xs, sizes) if c > 0]

    # Small-size fallback: below a couple of MiB a standalone custom call plus
    # per-input DMA overhead dominates, and jnp.concatenate can fuse with
    # neighbouring XLA ops.  Also covers degenerate (zero-sized) outputs.
    if (total_bytes < small_fallback_bytes or not nonempty
            or outer == 0 or inner == 0):
        return jnp.concatenate(xs, axis=d)

    # Flatten the (C_i, inner) dims so each per-row destination run is one
    # contiguous burst (don't rely on Mosaic to coalesce a 3-D strided copy).
    xs2d = [x.reshape(outer, c * inner) for x, c in nonempty]
    lengths = [a.shape[1] for a in xs2d]
    col_offsets = []
    off = 0
    for _, c in nonempty:
        col_offsets.append(off * inner)
        off += c

    plan = _build_copy_plan(lengths, outer, col_offsets, itemsize,
                            max_splits_per_input)
    kernel = _make_concat_dma_kernel(plan, len(xs2d))

    out2d = pl.pallas_call(
        kernel,
        out_shape=jax.ShapeDtypeStruct((outer, total * inner), out_dtype),
        # Keep everything in HBM; no BlockSpec tiling / VMEM round trip.
        in_specs=[pl.BlockSpec(memory_space=pl.ANY) for _ in xs2d],
        out_specs=pl.BlockSpec(memory_space=pl.ANY),
        scratch_shapes=[pltpu.SemaphoreType.DMA((len(plan),))],
        # Advisory: pure bandwidth-bound copy (read + write every byte once).
        cost_estimate=pl.CostEstimate(
            flops=0, transcendentals=0, bytes_accessed=2 * total_bytes),
    )(*xs2d)

    return out2d.reshape(out_shape)


if __name__ == "__main__":
    key = jax.random.PRNGKey(0)
    k1, k2, k3, k4, k5, k6 = jax.random.split(key, 6)

    # 1) Small NCHW case (the module's typical YOLO use) -> small-size fallback.
    x1 = jax.random.normal(k1, (2, 4, 16, 16), dtype=jnp.float32)
    x2 = jax.random.normal(k2, (2, 6, 16, 16), dtype=jnp.float32)
    ref = jnp.concatenate([x1, x2], axis=1)
    out = jax.block_until_ready(pallas_concat([x1, x2], dimension=1))
    assert out.shape == ref.shape and jnp.array_equal(out, ref)

    # 2) Same inputs, forced through the DMA-kernel path (row-contiguous copies).
    out = jax.block_until_ready(
        pallas_concat([x1, x2], dimension=1, small_fallback_bytes=0))
    assert jnp.array_equal(out, ref)

    # 3) Batch-1 (fully contiguous destination) + negative dim, forced kernel.
    y1 = jax.random.normal(k3, (1, 4, 16, 16), dtype=jnp.float32)
    y2 = jax.random.normal(k4, (1, 6, 16, 16), dtype=jnp.float32)
    refy = jnp.concatenate([y1, y2], axis=1)
    out = jax.block_until_ready(
        pallas_concat([y1, y2], dimension=-3, small_fallback_bytes=0))
    assert out.shape == refy.shape and jnp.array_equal(out, refy)

    # 4) Slightly larger inputs to exercise the multi-descriptor (split) path.
    z1 = jax.random.normal(k5, (2, 8, 64, 64), dtype=jnp.float32)
    z2 = jax.random.normal(k6, (2, 8, 64, 64), dtype=jnp.float32)
    refz = jnp.concatenate([z1, z2], axis=1)
    out = jax.block_until_ready(
        pallas_concat([z1, z2], dimension=1, small_fallback_bytes=0))
    assert out.shape == refz.shape and jnp.array_equal(out, refz)

    print("KERNEL_OK")
</pallas_src>

<mosaic_0001>
module attributes {stable_mosaic.version = 11 : i64} {
  func.func @kernel(%arg0: memref<2x1024xf32, #tpu.memory_space<any>>, %arg1: memref<2x1536xf32, #tpu.memory_space<any>>, %arg2: memref<2x2560xf32, #tpu.memory_space<any>>, %arg3: memref<2x!tpu.dma_semaphore, #tpu.memory_space<semaphore_mem>>) attributes {dimension_semantics = [], scalar_prefetch = 0 : i64, scratch_operands = 1 : i64, tpu.core_type = #tpu.core_type<tc>} {
    %c0_i32 = arith.constant 0 : i32
    %c0_i32_0 = arith.constant 0 : i32
    %c0_i32_1 = arith.constant 0 : i32
    %0 = tpu.memref_slice %arg0[%c0_i32_0, %c0_i32_1] : memref<2x1024xf32, #tpu.memory_space<any>> -> memref<2x1024xf32, #tpu.memory_space<any>>
    %c0_i32_2 = arith.constant 0 : i32
    %c0_i32_3 = arith.constant 0 : i32
    %1 = tpu.memref_slice %arg2[%c0_i32_2, %c0_i32_3] : memref<2x2560xf32, #tpu.memory_space<any>> -> memref<2x1024xf32, #tpu.memory_space<any>>
    %2 = tpu.memref_slice %arg3[%c0_i32] : memref<2x!tpu.dma_semaphore, #tpu.memory_space<semaphore_mem>> -> memref<1x!tpu.dma_semaphore, #tpu.memory_space<semaphore_mem>>
    %3 = tpu.memref_squeeze %2 : memref<1x!tpu.dma_semaphore, #tpu.memory_space<semaphore_mem>> -> memref<!tpu.dma_semaphore, #tpu.memory_space<semaphore_mem>>
    tpu.enqueue_dma source(%0 : memref<2x1024xf32, #tpu.memory_space<any>>) target(%1 : memref<2x1024xf32, #tpu.memory_space<any>>) target_semaphore(%3 : memref<!tpu.dma_semaphore, #tpu.memory_space<semaphore_mem>>)
    %c1_i32 = arith.constant 1 : i32
    %c0_i32_4 = arith.constant 0 : i32
    %c0_i32_5 = arith.constant 0 : i32
    %4 = tpu.memref_slice %arg1[%c0_i32_4, %c0_i32_5] : memref<2x1536xf32, #tpu.memory_space<any>> -> memref<2x1536xf32, #tpu.memory_space<any>>
    %c0_i32_6 = arith.constant 0 : i32
    %c1024_i32 = arith.constant 1024 : i32
    %5 = tpu.memref_slice %arg2[%c0_i32_6, %c1024_i32] : memref<2x2560xf32, #tpu.memory_space<any>> -> memref<2x1536xf32, #tpu.memory_space<any>>
    %6 = tpu.memref_slice %arg3[%c1_i32] : memref<2x!tpu.dma_semaphore, #tpu.memory_space<semaphore_mem>> -> memref<1x!tpu.dma_semaphore, #tpu.memory_space<semaphore_mem>>
    %7 = tpu.memref_squeeze %6 : memref<1x!tpu.dma_semaphore, #tpu.memory_space<semaphore_mem>> -> memref<!tpu.dma_semaphore, #tpu.memory_space<semaphore_mem>>
    tpu.enqueue_dma source(%4 : memref<2x1536xf32, #tpu.memory_space<any>>) target(%5 : memref<2x1536xf32, #tpu.memory_space<any>>) target_semaphore(%7 : memref<!tpu.dma_semaphore, #tpu.memory_space<semaphore_mem>>)
    %c0_i32_7 = arith.constant 0 : i32
    %c0_i32_8 = arith.constant 0 : i32
    %c0_i32_9 = arith.constant 0 : i32
    %8 = tpu.memref_slice %arg0[%c0_i32_8, %c0_i32_9] : memref<2x1024xf32, #tpu.memory_space<any>> -> memref<2x1024xf32, #tpu.memory_space<any>>
    %c0_i32_10 = arith.constant 0 : i32
    %c0_i32_11 = arith.constant 0 : i32
    %9 = tpu.memref_slice %arg2[%c0_i32_10, %c0_i32_11] : memref<2x2560xf32, #tpu.memory_space<any>> -> memref<2x1024xf32, #tpu.memory_space<any>>
    %10 = tpu.memref_slice %arg3[%c0_i32_7] : memref<2x!tpu.dma_semaphore, #tpu.memory_space<semaphore_mem>> -> memref<1x!tpu.dma_semaphore, #tpu.memory_space<semaphore_mem>>
    %11 = tpu.memref_squeeze %10 : memref<1x!tpu.dma_semaphore, #tpu.memory_space<semaphore_mem>> -> memref<!tpu.dma_semaphore, #tpu.memory_space<semaphore_mem>>
    tpu.wait_dma2 semaphore(%11 : memref<!tpu.dma_semaphore, #tpu.memory_space<semaphore_mem>>) src(%8 : memref<2x1024xf32, #tpu.memory_space<any>>) dst(%9 : memref<2x1024xf32, #tpu.memory_space<any>>)
    %c1_i32_12 = arith.constant 1 : i32
    %c0_i32_13 = arith.constant 0 : i32
    %c0_i32_14 = arith.constant 0 : i32
    %12 = tpu.memref_slice %arg1[%c0_i32_13, %c0_i32_14] : memref<2x1536xf32, #tpu.memory_space<any>> -> memref<2x1536xf32, #tpu.memory_space<any>>
    %c0_i32_15 = arith.constant 0 : i32
    %c1024_i32_16 = arith.constant 1024 : i32
    %13 = tpu.memref_slice %arg2[%c0_i32_15, %c1024_i32_16] : memref<2x2560xf32, #tpu.memory_space<any>> -> memref<2x1536xf32, #tpu.memory_space<any>>
    %14 = tpu.memref_slice %arg3[%c1_i32_12] : memref<2x!tpu.dma_semaphore, #tpu.memory_space<semaphore_mem>> -> memref<1x!tpu.dma_semaphore, #tpu.memory_space<semaphore_mem>>
    %15 = tpu.memref_squeeze %14 : memref<1x!tpu.dma_semaphore, #tpu.memory_space<semaphore_mem>> -> memref<!tpu.dma_semaphore, #tpu.memory_space<semaphore_mem>>
    tpu.wait_dma2 semaphore(%15 : memref<!tpu.dma_semaphore, #tpu.memory_space<semaphore_mem>>) src(%12 : memref<2x1536xf32, #tpu.memory_space<any>>) dst(%13 : memref<2x1536xf32, #tpu.memory_space<any>>)
    return
  }
}

</mosaic_0001>

<bundles_post_ra>
// kernel: tpu_custom_call.1
= control target key start
LH: loop header
LB: loop body
LE: loop exit
PB: predicated region body
PF: predicated region fallthrough
CT: control target
= control target key end

     0   :  { %s66_s12 = smov [#allocation2]   ;;  %s67_s13 = smov [#allocation3]   ;;  %s98_s0 = inlined_call_operand.hbm [shape: f32[2,1024], index: 0, kind: input, shape index: {}]   ;;  %s99_s2 = inlined_call_operand.hbm [shape: f32[2,2560], index: 2, kind: output, shape index: {}]   ;;  %s100_s1 = inlined_call_operand.hbm [shape: f32[2,1536], index: 1, kind: input, shape index: {}]  }
   0x1   :  { %s20_s11 = scalar_lea.hbm %s99_s2, 256  ;;  %s68_s14 = smov 0  }
   0x2   :  { %19 = dma.general %s98_s0, 256, %s99_s2, %s66_s12, %s67_s13, [#allocation4], %s68_s14, 0  }
   0x3   :  { %s69_s19 = smov [#allocation2 + $0x1]   ;;  %s70_s20 = smov [#allocation5]  }
   0x4   :  { %34 = dma.general %s100_s1, 384, %s20_s11, %s69_s19, %s70_s20, [#allocation6], %s68_s14, 0  }
   0x5   :  { %62 = dma.done.wait [#allocation2], 256 }
   0x6   :  { %63 = vsyncadd [#allocation2], 4294967040 }
   0x7   :  { %64 = dma.done.wait [#allocation2 + $0x1], 384 }
   0x8   :  { %65 = vsyncadd [#allocation2 + $0x1], 4294966912 }
   0x9   :  { %42 = vsyncmov [#allocation2] }
   0xc   :  { %s43_s23 = vpop.sfrf %42 }
   0xd   :  { %p55_p0 = scmp.ne.s32.totalorder %s43_s23, 0 }
   0xf   :  { %47 = shalt.err (%p55_p0)  }
  0x10   :  { %49 = vsyncmov [#allocation2 + $0x1] }
  0x13   :  { %s50_s24 = vpop.sfrf %49 }
  0x14   :  { %p56_p1 = scmp.ne.s32.totalorder %s50_s24, 0 }
  0x16   :  { %54 = shalt.err (%p56_p1)  }

</bundles_post_ra>
